<compile_context>
chip_gen: v5e
topology: v5e:2x2
jax: 0.10.0
libtpu: 0.0.40
codegen_flags: <defaults>
</compile_context>

<pallas_src>
import functools
import math

import jax
import jax.numpy as jnp
from jax import lax
from jax.experimental import pallas as pl
from jax.experimental.pallas import tpu as pltpu

FOCAL_GAMMA = 2.0
FOCAL_ALPHA = 0.25
EPS = 1e-7
LANES = 128
MIB = 1024 * 1024

# Test hook: force the tiled path (dict with "tile" and optional "ncores").
_TEST_FORCE_PLAN = None


def _cdiv(a, b):
    return -(-a // b)


def _round_up(x, m):
    return _cdiv(x, m) * m


@functools.lru_cache(maxsize=None)
def _hw():
    """(num_tensorcores, physical_vmem_bytes, per-step input-byte target)."""
    kind = ""
    try:
        kind = jax.devices()[0].device_kind.lower()
    except Exception:
        pass
    megacore = any(tag in kind for tag in ("v4", "v5p", "v7"))
    vmem = None
    try:
        vmem = int(getattr(pltpu.get_tpu_info(), "vmem_capacity_bytes", 0)) or None
    except Exception:
        vmem = None
    if vmem is None:
        vmem = (64 if "v7" in kind else 128) * MIB
    step_target = (4 if "v7" in kind else 2) * MIB
    return (2 if megacore else 1), vmem, step_target


# ----------------------------------------------------------------------------
# Elementwise loss bodies (traced inside the kernel, f32 in / f32 out)
# ----------------------------------------------------------------------------
def _focal_elem(x, t, gamma, alpha):
    e = jnp.exp(-jnp.abs(x))               # reused by sigmoid AND stable BCE
    inv = 1.0 / (1.0 + e)
    p = jnp.where(x >= 0, inv, e * inv)    # sigmoid(x) without a second exp
    pt = (1.0 - p) * t + p * (1.0 - t)
    if float(gamma) == 2.0:
        mod = pt * pt                      # avoid pow on the EUP
    elif float(gamma) == 1.0:
        mod = pt
    else:
        mod = pt ** gamma
    alpha_w = alpha * t + (1.0 - alpha) * (1.0 - t)
    bce = jnp.maximum(x, 0.0) - x * t + jnp.log1p(e)
    return bce * alpha_w * mod


def _bce_elem(x, t):
    return jnp.maximum(x, 0.0) - x * t + jnp.log1p(jnp.exp(-jnp.abs(x)))


def _giou_lanes(b):
    """b: (8, T) = [pred x1,y1,x2,y2 ; target x1,y1,x2,y2] -> (1, T) loss."""
    px1, py1, px2, py2 = b[0:1], b[1:2], b[2:3], b[3:4]
    tx1, ty1, tx2, ty2 = b[4:5], b[5:6], b[6:7], b[7:8]
    area_p = (px2 - px1) * (py2 - py1)
    area_t = (tx2 - tx1) * (ty2 - ty1)
    iw = jnp.maximum(jnp.minimum(px2, tx2) - jnp.maximum(px1, tx1), 0.0)
    ih = jnp.maximum(jnp.minimum(py2, ty2) - jnp.maximum(py1, ty1), 0.0)
    inter = iw * ih
    union = jnp.maximum(area_p + area_t - inter, EPS)
    iou = inter / union
    cw = jnp.maximum(px2, tx2) - jnp.minimum(px1, tx1)
    ch = jnp.maximum(py2, ty2) - jnp.minimum(py1, ty1)
    area_c = jnp.maximum(cw * ch, EPS)
    giou = iou - (area_c - union) / area_c
    return 1.0 - giou


# ----------------------------------------------------------------------------
# Branch analysis (pure Python on shapes/dtypes; no data movement)
# ----------------------------------------------------------------------------
def _analyze_pointwise(pred, target, weight, body, flops_per_elem, trans_per_elem):
    pred = jnp.asarray(pred)
    target = jnp.asarray(target)
    n = pred.shape[0]
    c = int(math.prod(pred.shape[1:])) if pred.ndim > 1 else 1
    info = dict(kind="pointwise", n=n, c=c, body=body,
                pred=pred.reshape(n, c), target=target.reshape(n, c),
                w_scale=None, w_arr=None, w_per_loc=False)
    if weight is None:
        pass
    elif isinstance(weight, (int, float)):
        info["w_scale"] = float(weight)
    else:
        w = jnp.asarray(weight)
        if w.ndim == 0:
            info["w_scale"] = w
        elif w.size == n * c:
            info["w_arr"] = w.reshape(n, c)
        elif w.size == n:
            info["w_arr"] = w.reshape(n, 1)
            info["w_per_loc"] = c > 1
        else:
            # TODO(synk): odd broadcastable weight shapes fall back to a host
            # broadcast (one extra HBM pass on this branch only).
            info["w_arr"] = jnp.broadcast_to(w.reshape(n, -1), (n, c))

    if info["w_per_loc"]:
        layout = "nc"
    elif (n * c) % LANES == 0:
        layout = "flat"            # free row-major reshape to [N*C/128, 128]
    elif c == 1:
        layout = "row"             # free reshape to [1, N] (lane-major)
    else:
        # TODO(synk): small-C branches with N*C not lane-aligned stream as
        # [N, C] blocks (lane padding in VMEM/vregs only; HBM bytes are exact).
        layout = "nc"
    info["layout"] = layout
    info["quantum"] = {"flat": 1024, "row": 128, "nc": 8}[layout]

    pb, tb = pred.dtype.itemsize, target.dtype.itemsize
    hbm = (pb + tb) * c
    if layout == "flat":
        vmem = (pb + tb) * c
    elif layout == "row":
        vmem = 8 * (pb + tb)                       # (1, tile) sublane-pads 1->8
    else:
        vmem = (pb + tb) * _round_up(c, LANES)
    if info["w_arr"] is not None:
        ws = info["w_arr"].dtype.itemsize
        if info["w_per_loc"]:
            hbm += ws
            vmem += ws * LANES
        else:
            hbm += ws * c
            vmem += ws * ({"flat": c, "row": 8}.get(layout, _round_up(c, LANES)))
    info.update(hbm_per_loc=hbm, vmem_per_loc=vmem,
                flops=(flops_per_elem + 2) * n * c,
                transcendentals=trans_per_elem * n * c)
    return info


def _analyze_giou(pred, target, weight):
    pred = jnp.asarray(pred)
    target = jnp.asarray(target)
    n = pred.shape[0]
    # coordinate-major (8, N) pack: exact (8,128)-tiled blocks, lane-dense.
    boxes = jnp.concatenate([pred.reshape(n, 4).T, target.reshape(n, 4).T], axis=0)
    info = dict(kind="giou", n=n, boxes=boxes, w_scale=None, w_arr=None)
    if weight is None:
        pass
    elif isinstance(weight, (int, float)):
        info["w_scale"] = float(weight)
    else:
        w = jnp.asarray(weight)
        if w.ndim == 0:
            info["w_scale"] = w
        elif w.size == n:
            info["w_arr"] = w.reshape(1, n)
        else:
            # TODO(synk): per-coordinate GIoU weights collapse to the per-box
            # column (small host-side slice).
            info["w_arr"] = w.reshape(n, -1)[:, :1].reshape(1, n)
    bs = boxes.dtype.itemsize
    hbm, vmem = 8 * bs, 8 * bs
    if info["w_arr"] is not None:
        ws = info["w_arr"].dtype.itemsize
        hbm += ws
        vmem += 8 * ws                             # (1, tile) sublane-pads 1->8
    info.update(hbm_per_loc=hbm, vmem_per_loc=vmem, quantum=128,
                flops=32 * n, transcendentals=0)
    return info


# ----------------------------------------------------------------------------
# Tiling plan (generation-aware)
# ----------------------------------------------------------------------------
def _plan(n, infos):
    ncores_hw, vmem_phys, step_target = _hw()
    quantum = max([i["quantum"] for i in infos] + [8])
    if _TEST_FORCE_PLAN is not None:
        ncores = int(_TEST_FORCE_PLAN.get("ncores", 1))
        tile = int(_TEST_FORCE_PLAN["tile"])
        tpc = max(1, _cdiv(_cdiv(n, ncores), tile))
        return dict(ncores=ncores, tpc=tpc, tile=tile, single=False)
    hbm = sum(i["hbm_per_loc"] for i in infos)
    vmem = sum(i["vmem_per_loc"] for i in infos)
    # Small-problem fast path: whole arrays as single blocks, no masking.
    if 2 * n * vmem + 4 * MIB <= min(24 * MIB, vmem_phys // 4):
        return dict(ncores=1, tpc=1, tile=n, single=True)
    ncores = ncores_hw if n >= 4 * quantum * ncores_hw else 1
    budget = min(max(vmem_phys - 24 * MIB, 8 * MIB), 100 * MIB)
    tile = max(step_target // max(hbm, 1), quantum)
    tile = min(tile, budget // max(2 * vmem, 1))
    tile = min(tile, _round_up(_cdiv(n, ncores), quantum))
    tile = max(quantum, (tile // quantum) * quantum)
    tpc = max(1, _cdiv(_cdiv(n, ncores), tile))
    return dict(ncores=ncores, tpc=tpc, tile=tile, single=False)


# ----------------------------------------------------------------------------
# Branch builders: arrays + BlockSpecs + in-kernel compute closure
# ----------------------------------------------------------------------------
def _build_pointwise(info, plan):
    n, c = info["n"], info["c"]
    tpc = plan["tpc"]
    layout = info["layout"]
    w_arr = info["w_arr"]
    arrays, specs, block_shapes = [], [], []

    if layout == "flat":
        rows_total = (n * c) // LANES
        block_rows = rows_total if plan["single"] else (plan["tile"] * c) // LANES
        max_block = max(_cdiv(rows_total, block_rows) - 1, 0)

        def imap(ci, i, _t=tpc, _m=max_block):
            return (jnp.minimum(ci * _t + i, _m), 0)

        shp = (block_rows, LANES)
        spec = pl.BlockSpec(shp, imap)
        for a in (info["pred"], info["target"]):
            arrays.append(a.reshape(rows_total, LANES))
            specs.append(spec)
            block_shapes.append(shp)
        if w_arr is not None:
            arrays.append(w_arr.reshape(rows_total, LANES))
            specs.append(spec)
            block_shapes.append(shp)
        acc_shape = (1, LANES)
        mask_axis, mask_extent, mask_total = 0, block_rows, rows_total
        needs_mask = plan["ncores"] * tpc * block_rows != rows_total

    elif layout == "row":           # c == 1, N not lane-aligned
        block_cols = n if plan["single"] else plan["tile"]
        max_block = max(_cdiv(n, block_cols) - 1, 0)

        def imap(ci, i, _t=tpc, _m=max_block):
            return (0, jnp.minimum(ci * _t + i, _m))

        shp = (1, block_cols)
        spec = pl.BlockSpec(shp, imap)
        for a in (info["pred"], info["target"]):
            arrays.append(a.reshape(1, n))
            specs.append(spec)
            block_shapes.append(shp)
        if w_arr is not None:
            arrays.append(w_arr.reshape(1, n))
            specs.append(spec)
            block_shapes.append(shp)
        acc_shape = (1, block_cols)
        mask_axis, mask_extent, mask_total = 1, block_cols, n
        needs_mask = plan["ncores"] * tpc * block_cols != n

    else:                            # "nc": [N, C] blocks (per-loc weight / fallback)
        block_rows = n if plan["single"] else plan["tile"]
        max_block = max(_cdiv(n, block_rows) - 1, 0)

        def imap(ci, i, _t=tpc, _m=max_block):
            return (jnp.minimum(ci * _t + i, _m), 0)

        shp = (block_rows, c)
        spec = pl.BlockSpec(shp, imap)
        arrays += [info["pred"], info["target"]]
        specs += [spec, spec]
        block_shapes += [shp, shp]
        if w_arr is not None:
            if info["w_per_loc"]:
                wshp = (block_rows, 1)
                arrays.append(w_arr)
                specs.append(pl.BlockSpec(wshp, imap))
                block_shapes.append(wshp)
            else:
                arrays.append(w_arr)
                specs.append(spec)
                block_shapes.append(shp)
        acc_shape = (1, c)
        mask_axis, mask_extent, mask_total = 0, block_rows, n
        needs_mask = plan["ncores"] * tpc * block_rows != n

    has_w = w_arr is not None
    body = info["body"]

    def compute(refs, block_idx, _body=body, _has_w=has_w, _mask=needs_mask,
                _axis=mask_axis, _extent=mask_extent, _total=mask_total):
        x = refs[0][...].astype(jnp.float32)
        t = refs[1][...].astype(jnp.float32)
        loss = _body(x, t)
        if _has_w:
            loss = loss * refs[2][...].astype(jnp.float32)   # broadcasts (tile,1)
        if _mask:
            pos = lax.broadcasted_iota(jnp.int32, loss.shape, _axis)
            loss = jnp.where(block_idx * _extent + pos < _total, loss, 0.0)
        return jnp.sum(loss, axis=0, keepdims=True)          # sublane reduce

    return dict(arrays=arrays, in_specs=specs, block_shapes=block_shapes,
                acc_shape=acc_shape, compute=compute, w_scale=info["w_scale"],
                flops=info["flops"], transcendentals=info["transcendentals"])


def _build_giou(info, plan):
    n = info["n"]
    tpc = plan["tpc"]
    block = n if plan["single"] else plan["tile"]
    max_block = max(_cdiv(n, block) - 1, 0)

    def imap(ci, i, _t=tpc, _m=max_block):
        return (0, jnp.minimum(ci * _t + i, _m))

    arrays = [info["boxes"]]
    specs = [pl.BlockSpec((8, block), imap)]
    block_shapes = [(8, block)]
    has_w = info["w_arr"] is not None
    if has_w:
        arrays.append(info["w_arr"])
        specs.append(pl.BlockSpec((1, block), imap))
        block_shapes.append((1, block))
    needs_mask = plan["ncores"] * tpc * block != n

    def compute(refs, block_idx, _has_w=has_w, _mask=needs_mask, _b=block, _n=n):
        loss = _giou_lanes(refs[0][...].astype(jnp.float32))
        if _has_w:
            loss = loss * refs[1][...].astype(jnp.float32)
        if _mask:
            lane = lax.broadcasted_iota(jnp.int32, loss.shape, 1)
            loss = jnp.where(block_idx * _b + lane < _n, loss, 0.0)
        return loss                                  # lane-wise accumulation

    return dict(arrays=arrays, in_specs=specs, block_shapes=block_shapes,
                acc_shape=(1, block), compute=compute, w_scale=info["w_scale"],
                flops=info["flops"], transcendentals=info["transcendentals"])


def _build(info, plan):
    return _build_giou(info, plan) if info["kind"] == "giou" else _build_pointwise(info, plan)


def _padded_block_bytes(shape, dtype):
    dtype = jnp.dtype(dtype)
    shape = tuple(int(s) for s in shape)
    if len(shape) < 2:
        shape = (1,) * (2 - len(shape)) + shape
    lead = int(math.prod(shape[:-2])) if len(shape) > 2 else 1
    sub = 8 * max(1, 4 // dtype.itemsize)
    return lead * _round_up(shape[-2], sub) * _round_up(shape[-1], LANES) * dtype.itemsize


# ----------------------------------------------------------------------------
# Fused launcher: one pallas_call over all requested branches
# ----------------------------------------------------------------------------
def _launch(built, plan):
    ncores, tpc = plan["ncores"], plan["tpc"]
    nb = len(built)
    counts = [len(b["arrays"]) for b in built]
    offs = [0]
    for k in counts:
        offs.append(offs[-1] + k)
    total_in = offs[-1]
    computes = [b["compute"] for b in built]

    def kernel(*refs):
        in_refs = refs[:total_in]
        out_refs = refs[total_in:total_in + nb]
        acc_refs = refs[total_in + nb:]
        ci = pl.program_id(0)
        step = pl.program_id(1)
        block = ci * tpc + step

        @pl.when(step == 0)
        def _init():
            for acc in acc_refs:
                acc[...] = jnp.zeros_like(acc)

        for b in range(nb):
            contrib = computes[b](in_refs[offs[b]:offs[b + 1]], block)
            acc_refs[b][...] = acc_refs[b][...] + contrib

        @pl.when(step == pl.num_programs(1) - 1)
        def _finalize():
            for b in range(nb):
                out_refs[b][...] = acc_refs[b][...][None]

    arrays, in_specs, out_shapes, out_specs, scratch = [], [], [], [], []
    flops = trans = hbm_bytes = 0
    in_block_bytes = out_block_bytes = acc_bytes = 0
    for b in built:
        arrays += b["arrays"]
        in_specs += b["in_specs"]
        acc = b["acc_shape"]
        out_shapes.append(jax.ShapeDtypeStruct((ncores,) + acc, jnp.float32))
        out_specs.append(pl.BlockSpec((1,) + acc, lambda ci, i: (ci, 0, 0)))
        scratch.append(pltpu.VMEM(acc, jnp.float32))
        flops += b["flops"]
        trans += b["transcendentals"]
        hbm_bytes += sum(int(a.size) * a.dtype.itemsize for a in b["arrays"])
        in_block_bytes += sum(_padded_block_bytes(s, a.dtype)
                              for s, a in zip(b["block_shapes"], b["arrays"]))
        out_block_bytes += _padded_block_bytes((1,) + acc, jnp.float32)
        acc_bytes += _padded_block_bytes(acc, jnp.float32)

    _, vmem_phys, _ = _hw()
    vmem_limit = 2 * in_block_bytes + 2 * out_block_bytes + acc_bytes + 2 * MIB
    vmem_limit = int(min(max(vmem_limit, 16 * MIB), max(vmem_phys - 8 * MIB, 32 * MIB)))

    outs = pl.pallas_call(
        kernel,
        out_shape=tuple(out_shapes),
        grid=(ncores, tpc),
        in_specs=in_specs,
        out_specs=tuple(out_specs),
        scratch_shapes=tuple(scratch),
        compiler_params=pltpu.CompilerParams(
            dimension_semantics=("parallel", "arbitrary"),
            vmem_limit_bytes=vmem_limit),
        cost_estimate=pl.CostEstimate(
            flops=int(flops), transcendentals=int(trans),
            bytes_accessed=int(hbm_bytes + ncores * acc_bytes)),
    )(*arrays)

    sums = []
    for b, o in zip(built, outs):
        s = jnp.sum(o)                      # tiny per-core partials -> scalar
        if b["w_scale"] is not None:
            s = s * b["w_scale"]
        sums.append(s)
    return sums


def _norm(avg_factor):
    af = 1.0 if avg_factor is None else avg_factor
    return jnp.maximum(jnp.asarray(af, jnp.float32), 1.0)


# ----------------------------------------------------------------------------
# Sub-loss modules (hat-style: pred/target/weight/avg_factor kwargs)
# ----------------------------------------------------------------------------
class FocalLoss:
    loss_name = "cls_loss"

    def __init__(self, gamma=FOCAL_GAMMA, alpha=FOCAL_ALPHA):
        self.gamma = float(gamma)
        self.alpha = float(alpha)

    def _body(self):
        return functools.partial(_focal_elem, gamma=self.gamma, alpha=self.alpha)

    def _info(self, pred, target, weight):
        return _analyze_pointwise(pred, target, weight, self._body(),
                                  flops_per_elem=20, trans_per_elem=2)

    def __call__(self, pred, target, weight=None, avg_factor=None, **_):
        info = self._info(pred, target, weight)
        plan = _plan(info["n"], [info])
        (s,) = _launch([_build(info, plan)], plan)
        return s / _norm(avg_factor)


class GIoULoss:
    loss_name = "reg_loss"

    def _info(self, pred, target, weight):
        return _analyze_giou(pred, target, weight)

    def __call__(self, pred, target, weight=None, avg_factor=None, **_):
        info = self._info(pred, target, weight)
        plan = _plan(info["n"], [info])
        (s,) = _launch([_build(info, plan)], plan)
        return s / _norm(avg_factor)


class CenternessBCELoss:
    loss_name = "centerness_loss"

    def _info(self, pred, target, weight):
        return _analyze_pointwise(pred, target, weight, _bce_elem,
                                  flops_per_elem=6, trans_per_elem=2)

    def __call__(self, pred, target, weight=None, avg_factor=None, **_):
        info = self._info(pred, target, weight)
        plan = _plan(info["n"], [info])
        (s,) = _launch([_build(info, plan)], plan)
        return {self.loss_name: s / _norm(avg_factor)}


# ----------------------------------------------------------------------------
# FCOSLoss wrapper (same forward semantics as the PyTorch module)
# ----------------------------------------------------------------------------
class FCOSLoss:
    def __init__(self, cls_loss, reg_loss, centerness_loss=None):
        self.cls_loss = cls_loss
        self.reg_loss = reg_loss
        self.centerness_loss = centerness_loss

    def _can_fuse(self, target):
        return (self.centerness_loss is not None
                and len(target) == 3
                and isinstance(self.cls_loss, FocalLoss)
                and isinstance(self.reg_loss, GIoULoss)
                and isinstance(self.centerness_loss, CenternessBCELoss))

    def _fused_forward(self, target):
        t_cls, t_reg, t_ctr = target
        infos = [
            self.cls_loss._info(t_cls["pred"], t_cls["target"], t_cls.get("weight")),
            self.reg_loss._info(t_reg["pred"], t_reg["target"], t_reg.get("weight")),
            self.centerness_loss._info(t_ctr["pred"], t_ctr["target"], t_ctr.get("weight")),
        ]
        n = infos[0]["n"]
        assert all(i["n"] == n for i in infos)
        plan = _plan(n, infos)
        built = [_build(i, plan) for i in infos]
        sums = _launch(built, plan)
        return {
            "cls_loss": sums[0] / _norm(t_cls.get("avg_factor")),
            "reg_loss": sums[1] / _norm(t_reg.get("avg_factor")),
            self.centerness_loss.loss_name: sums[2] / _norm(t_ctr.get("avg_factor")),
        }

    def __call__(self, pred, target):
        if self._can_fuse(target):
            return self._fused_forward(target)
        # Generic (un-fused) dispatch — mirrors the PyTorch forward exactly.
        res = {}
        cls_res = self.cls_loss(**target[0])
        reg_res = self.reg_loss(**target[1])
        if not isinstance(cls_res, dict):
            cls_res = {"cls_loss": cls_res}
        if not isinstance(reg_res, dict):
            reg_res = {"reg_loss": reg_res}
        res.update(cls_res)
        res.update(reg_res)
        if self.centerness_loss is not None:
            assert len(target) == 3
            ctr_res = self.centerness_loss(**target[2])
            res.update(ctr_res)
            assert len(res) == len(cls_res) + len(reg_res) + len(ctr_res)
        return res


# ----------------------------------------------------------------------------
# Pure-JAX references (sanity check)
# ----------------------------------------------------------------------------
def _ref_focal(pred, target, weight=None, avg_factor=None):
    x, t = pred.astype(jnp.float32), target.astype(jnp.float32)
    p = jax.nn.sigmoid(x)
    pt = (1 - p) * t + p * (1 - t)
    fw = (FOCAL_ALPHA * t + (1 - FOCAL_ALPHA) * (1 - t)) * pt ** FOCAL_GAMMA
    bce = jnp.maximum(x, 0.0) - x * t + jnp.log1p(jnp.exp(-jnp.abs(x)))
    loss = bce * fw
    if weight is not None:
        loss = loss * weight
    return jnp.sum(loss) / _norm(avg_factor)


def _ref_giou(pred, target, weight=None, avg_factor=None):
    p, t = pred.astype(jnp.float32), target.astype(jnp.float32)
    ap = (p[:, 2] - p[:, 0]) * (p[:, 3] - p[:, 1])
    at = (t[:, 2] - t[:, 0]) * (t[:, 3] - t[:, 1])
    iw = jnp.maximum(jnp.minimum(p[:, 2], t[:, 2]) - jnp.maximum(p[:, 0], t[:, 0]), 0)
    ih = jnp.maximum(jnp.minimum(p[:, 3], t[:, 3]) - jnp.maximum(p[:, 1], t[:, 1]), 0)
    inter = iw * ih
    union = jnp.maximum(ap + at - inter, EPS)
    iou = inter / union
    cw = jnp.maximum(p[:, 2], t[:, 2]) - jnp.minimum(p[:, 0], t[:, 0])
    ch = jnp.maximum(p[:, 3], t[:, 3]) - jnp.minimum(p[:, 1], t[:, 1])
    ac = jnp.maximum(cw * ch, EPS)
    loss = 1 - (iou - (ac - union) / ac)
    if weight is not None:
        w = weight[:, 0] if jnp.ndim(weight) == 2 else weight
        loss = loss * w
    return jnp.sum(loss) / _norm(avg_factor)


def _ref_bce(pred, target, weight=None, avg_factor=None):
    x, t = pred.astype(jnp.float32), target.astype(jnp.float32)
    loss = jnp.maximum(x, 0.0) - x * t + jnp.log1p(jnp.exp(-jnp.abs(x)))
    if weight is not None:
        loss = loss * weight
    return jnp.sum(loss) / _norm(avg_factor)


# ----------------------------------------------------------------------------
if __name__ == "__main__":
    import numpy as np

    key = jax.random.PRNGKey(0)
    key_a, key_b = jax.random.split(key)

    def make_inputs(n, num_classes, kk):
        k1, k2, k3, k4, k5, k6, k7 = jax.random.split(kk, 7)
        cls_pred = jax.random.normal(k1, (n, num_classes), dtype=jnp.float32)
        labels = jax.random.randint(k2, (n,), 0, num_classes + 1)
        cls_target = jax.nn.one_hot(labels, num_classes + 1,
                                    dtype=jnp.float32)[:, :num_classes]
        num_pos = jnp.maximum(jnp.sum(cls_target), 1.0)
        ctr_xy = jax.random.uniform(k3, (n, 2), minval=8.0, maxval=56.0)
        wh_p = jax.random.uniform(k4, (n, 2), minval=4.0, maxval=24.0)
        wh_t = jax.random.uniform(k5, (n, 2), minval=4.0, maxval=24.0)
        reg_pred = jnp.concatenate([ctr_xy - wh_p / 2, ctr_xy + wh_p / 2], axis=1)
        reg_target = jnp.concatenate([ctr_xy - wh_t / 2, ctr_xy + wh_t / 2], axis=1)
        pos = (cls_target.sum(axis=1, keepdims=True) > 0).astype(jnp.float32)
        ctr_pred = jax.random.normal(k6, (n, 1), dtype=jnp.float32)
        ctr_target = jnp.clip(jax.random.uniform(k7, (n, 1)), 0.0, 1.0)
        return dict(cls_pred=cls_pred, cls_target=cls_target, num_pos=num_pos,
                    reg_pred=reg_pred, reg_target=reg_target, pos=pos,
                    ctr_pred=ctr_pred, ctr_target=ctr_target)

    def check(res, target):
        np.testing.assert_allclose(np.array(res["cls_loss"]),
                                   np.array(_ref_focal(**target[0])),
                                   rtol=1e-3, atol=1e-5)
        np.testing.assert_allclose(np.array(res["reg_loss"]),
                                   np.array(_ref_giou(**target[1])),
                                   rtol=1e-3, atol=1e-5)
        if "centerness_loss" in res:
            np.testing.assert_allclose(np.array(res["centerness_loss"]),
                                       np.array(_ref_bce(**target[2])),
                                       rtol=1e-3, atol=1e-5)

    fcos = FCOSLoss(cls_loss=FocalLoss(), reg_loss=GIoULoss(),
                    centerness_loss=CenternessBCELoss())

    # --- Test A: small lane-aligned N=128 -> single-block fast path, flat layout.
    d = make_inputs(128, 8, key_a)
    target_a = (
        {"pred": d["cls_pred"], "target": d["cls_target"], "weight": None,
         "avg_factor": d["num_pos"]},
        {"pred": d["reg_pred"], "target": d["reg_target"], "weight": d["pos"],
         "avg_factor": jnp.maximum(jnp.sum(d["pos"]), 1.0)},
        {"pred": d["ctr_pred"], "target": d["ctr_target"], "weight": d["pos"],
         "avg_factor": jnp.maximum(jnp.sum(d["pos"]), 1.0)},
    )
    res_a = jax.block_until_ready(fcos(pred=None, target=target_a))
    check(res_a, target_a)

    # --- Test B: ragged N=700, forced multi-step / 2-core tiling to exercise
    # in-kernel tail masking, block-index clamping, the [N,1] per-location cls
    # weight broadcast and the lane-major c==1 centerness layout.
    d2 = make_inputs(700, 8, key_b)
    target_b = (
        {"pred": d2["cls_pred"], "target": d2["cls_target"], "weight": d2["pos"],
         "avg_factor": d2["num_pos"]},
        {"pred": d2["reg_pred"], "target": d2["reg_target"], "weight": d2["pos"],
         "avg_factor": jnp.maximum(jnp.sum(d2["pos"]), 1.0)},
        {"pred": d2["ctr_pred"], "target": d2["ctr_target"], "weight": d2["pos"],
         "avg_factor": jnp.maximum(jnp.sum(d2["pos"]), 1.0)},
    )
    _TEST_FORCE_PLAN = {"tile": 256, "ncores": 2}
    res_b = jax.block_until_ready(fcos(pred=None, target=target_b))
    _TEST_FORCE_PLAN = None
    check(res_b, target_b)

    # --- Test C: generic (un-fused) dispatch path, cls + reg only.
    fcos2 = FCOSLoss(cls_loss=FocalLoss(), reg_loss=GIoULoss())
    res_c = jax.block_until_ready(fcos2(pred=None, target=target_a[:2]))
    check(res_c, target_a[:2] + ({},))

    print("KERNEL_OK")
</pallas_src>

<mosaic_0001>
module attributes {stable_mosaic.version = 11 : i64} {
  func.func @kernel(%arg0: i32, %arg1: i32, %arg2: memref<8x128xf32, #tpu.memory_space<vmem>>, %arg3: memref<8x128xf32, #tpu.memory_space<vmem>>, %arg4: memref<8x128xf32, #tpu.memory_space<vmem>>, %arg5: memref<1x128xf32, #tpu.memory_space<vmem>>, %arg6: memref<1x128xf32, #tpu.memory_space<vmem>>, %arg7: memref<1x128xf32, #tpu.memory_space<vmem>>, %arg8: memref<1x128xf32, #tpu.memory_space<vmem>>, %arg9: memref<1x1x128xf32, #tpu.memory_space<vmem>>, %arg10: memref<1x1x128xf32, #tpu.memory_space<vmem>>, %arg11: memref<1x1x128xf32, #tpu.memory_space<vmem>>, %arg12: memref<1x128xf32, #tpu.memory_space<vmem>>, %arg13: memref<1x128xf32, #tpu.memory_space<vmem>>, %arg14: memref<1x128xf32, #tpu.memory_space<vmem>>) attributes {dimension_semantics = [#tpu.dimension_semantics<parallel>, #tpu.dimension_semantics<arbitrary>], iteration_bounds = array<i64: 1, 1>, scalar_prefetch = 0 : i64, scratch_operands = 3 : i64, tpu.core_type = #tpu.core_type<tc>, window_params = [{transform_indices = @transform_0, window_bounds = array<i64: 8, 128>}, {transform_indices = @transform_1, window_bounds = array<i64: 8, 128>}, {transform_indices = @transform_2, window_bounds = array<i64: 8, 128>}, {transform_indices = @transform_3, window_bounds = array<i64: 1, 128>}, {transform_indices = @transform_4, window_bounds = array<i64: 1, 128>}, {transform_indices = @transform_5, window_bounds = array<i64: 1, 128>}, {transform_indices = @transform_6, window_bounds = array<i64: 1, 128>}, {transform_indices = @transform_7, window_bounds = array<i64: 1, 1, 128>}, {transform_indices = @transform_8, window_bounds = array<i64: 1, 1, 128>}, {transform_indices = @transform_9, window_bounds = array<i64: 1, 1, 128>}]} {
    %c0_i32 = arith.constant 0 : i32
    %0 = arith.cmpi eq, %arg1, %c0_i32 : i32
    %1 = arith.extui %0 : i1 to i32
    %c0_i32_0 = arith.constant 0 : i32
    %2 = arith.cmpi ne, %1, %c0_i32_0 : i32
    scf.if %2 {
      %cst_46 = arith.constant 0.000000e+00 : f32
      %117 = vector.broadcast %cst_46 : f32 to vector<1x128xf32>
      %c0_47 = arith.constant 0 : index
      %c0_48 = arith.constant 0 : index
      %118 = vector.load %arg12[%c0_47, %c0_48] : memref<1x128xf32, #tpu.memory_space<vmem>>, vector<1x128xf32>
      tpu.vector_store %arg12[%c0_47, %c0_48], %117 {strides = array<i32>} : memref<1x128xf32, #tpu.memory_space<vmem>>, vector<1x128xf32>,
      %cst_49 = arith.constant 0.000000e+00 : f32
      %119 = vector.broadcast %cst_49 : f32 to vector<1x128xf32>
      %c0_50 = arith.constant 0 : index
      %c0_51 = arith.constant 0 : index
      %120 = vector.load %arg13[%c0_50, %c0_51] : memref<1x128xf32, #tpu.memory_space<vmem>>, vector<1x128xf32>
      tpu.vector_store %arg13[%c0_50, %c0_51], %119 {strides = array<i32>} : memref<1x128xf32, #tpu.memory_space<vmem>>, vector<1x128xf32>,
      %cst_52 = arith.constant 0.000000e+00 : f32
      %121 = vector.broadcast %cst_52 : f32 to vector<1x128xf32>
      %c0_53 = arith.constant 0 : index
      %c0_54 = arith.constant 0 : index
      %122 = vector.load %arg14[%c0_53, %c0_54] : memref<1x128xf32, #tpu.memory_space<vmem>>, vector<1x128xf32>
      tpu.vector_store %arg14[%c0_53, %c0_54], %121 {strides = array<i32>} : memref<1x128xf32, #tpu.memory_space<vmem>>, vector<1x128xf32>,
    } else {
    }
    %c0 = arith.constant 0 : index
    %c0_1 = arith.constant 0 : index
    %3 = vector.load %arg2[%c0, %c0_1] : memref<8x128xf32, #tpu.memory_space<vmem>>, vector<8x128xf32>
    %c0_2 = arith.constant 0 : index
    %c0_3 = arith.constant 0 : index
    %4 = vector.load %arg3[%c0_2, %c0_3] : memref<8x128xf32, #tpu.memory_space<vmem>>, vector<8x128xf32>
    %5 = math.absf %3 : vector<8x128xf32>
    %cst = arith.constant 0.000000e+00 : f32
    %6 = vector.broadcast %cst : f32 to vector<8x128xf32>
    %7 = arith.subf %6, %5 : vector<8x128xf32>
    %8 = math.exp %7 : vector<8x128xf32>
    %cst_4 = arith.constant 1.000000e+00 : f32
    %9 = vector.broadcast %cst_4 : f32 to vector<8x128xf32>
    %10 = arith.addf %9, %8 : vector<8x128xf32>
    %cst_5 = arith.constant 1.000000e+00 : f32
    %11 = vector.broadcast %cst_5 : f32 to vector<8x128xf32>
    %12 = arith.divf %11, %10 : vector<8x128xf32>
    %cst_6 = arith.constant 0.000000e+00 : f32
    %13 = vector.broadcast %cst_6 : f32 to vector<8x128xf32>
    %14 = arith.cmpf oge, %3, %13 : vector<8x128xf32>
    %15 = arith.mulf %8, %12 : vector<8x128xf32>
    %16 = arith.select %14, %12, %15 : vector<8x128xi1>, vector<8x128xf32>
    %cst_7 = arith.constant 1.000000e+00 : f32
    %17 = vector.broadcast %cst_7 : f32 to vector<8x128xf32>
    %18 = arith.subf %17, %16 : vector<8x128xf32>
    %19 = arith.mulf %18, %4 : vector<8x128xf32>
    %cst_8 = arith.constant 1.000000e+00 : f32
    %20 = vector.broadcast %cst_8 : f32 to vector<8x128xf32>
    %21 = arith.subf %20, %4 : vector<8x128xf32>
    %22 = arith.mulf %16, %21 : vector<8x128xf32>
    %23 = arith.addf %19, %22 : vector<8x128xf32>
    %24 = arith.mulf %23, %23 : vector<8x128xf32>
    %cst_9 = arith.constant 2.500000e-01 : f32
    %25 = vector.broadcast %cst_9 : f32 to vector<8x128xf32>
    %26 = arith.mulf %25, %4 : vector<8x128xf32>
    %cst_10 = arith.constant 1.000000e+00 : f32
    %27 = vector.broadcast %cst_10 : f32 to vector<8x128xf32>
    %28 = arith.subf %27, %4 : vector<8x128xf32>
    %cst_11 = arith.constant 7.500000e-01 : f32
    %29 = vector.broadcast %cst_11 : f32 to vector<8x128xf32>
    %30 = arith.mulf %29, %28 : vector<8x128xf32>
    %31 = arith.addf %26, %30 : vector<8x128xf32>
    %cst_12 = arith.constant 0.000000e+00 : f32
    %32 = vector.broadcast %cst_12 : f32 to vector<8x128xf32>
    %33 = arith.maximumf %3, %32 : vector<8x128xf32>
    %34 = arith.mulf %3, %4 : vector<8x128xf32>
    %35 = arith.subf %33, %34 : vector<8x128xf32>
    %36 = math.log1p %8 : vector<8x128xf32>
    %37 = arith.addf %35, %36 : vector<8x128xf32>
    %38 = arith.mulf %37, %31 : vector<8x128xf32>
    %39 = arith.mulf %38, %24 : vector<8x128xf32>
    %cst_13 = arith.constant dense<0.000000e+00> : vector<128xf32>
    %40 = vector.multi_reduction <add>, %39, %cst_13 [0] : vector<8x128xf32> to vector<128xf32>
    %41 = vector.shape_cast %40 : vector<128xf32> to vector<1x128xf32>
    %c0_14 = arith.constant 0 : index
    %c0_15 = arith.constant 0 : index
    %42 = vector.load %arg12[%c0_14, %c0_15] : memref<1x128xf32, #tpu.memory_space<vmem>>, vector<1x128xf32>
    %43 = arith.addf %42, %41 : vector<1x128xf32>
    %c0_16 = arith.constant 0 : index
    %c0_17 = arith.constant 0 : index
    %44 = vector.load %arg12[%c0_16, %c0_17] : memref<1x128xf32, #tpu.memory_space<vmem>>, vector<1x128xf32>
    tpu.vector_store %arg12[%c0_16, %c0_17], %43 {strides = array<i32>} : memref<1x128xf32, #tpu.memory_space<vmem>>, vector<1x128xf32>,
    %c0_18 = arith.constant 0 : index
    %c0_19 = arith.constant 0 : index
    %45 = vector.load %arg4[%c0_18, %c0_19] : memref<8x128xf32, #tpu.memory_space<vmem>>, vector<8x128xf32>
    %46 = vector.extract_strided_slice %45 {offsets = [0, 0], sizes = [1, 128], strides = [1, 1]} : vector<8x128xf32> to vector<1x128xf32>
    %47 = vector.extract_strided_slice %45 {offsets = [1, 0], sizes = [1, 128], strides = [1, 1]} : vector<8x128xf32> to vector<1x128xf32>
    %48 = vector.extract_strided_slice %45 {offsets = [2, 0], sizes = [1, 128], strides = [1, 1]} : vector<8x128xf32> to vector<1x128xf32>
    %49 = vector.extract_strided_slice %45 {offsets = [3, 0], sizes = [1, 128], strides = [1, 1]} : vector<8x128xf32> to vector<1x128xf32>
    %50 = vector.extract_strided_slice %45 {offsets = [4, 0], sizes = [1, 128], strides = [1, 1]} : vector<8x128xf32> to vector<1x128xf32>
    %51 = vector.extract_strided_slice %45 {offsets = [5, 0], sizes = [1, 128], strides = [1, 1]} : vector<8x128xf32> to vector<1x128xf32>
    %52 = vector.extract_strided_slice %45 {offsets = [6, 0], sizes = [1, 128], strides = [1, 1]} : vector<8x128xf32> to vector<1x128xf32>
    %53 = vector.extract_strided_slice %45 {offsets = [7, 0], sizes = [1, 128], strides = [1, 1]} : vector<8x128xf32> to vector<1x128xf32>
    %54 = arith.subf %48, %46 : vector<1x128xf32>
    %55 = arith.subf %49, %47 : vector<1x128xf32>
    %56 = arith.mulf %54, %55 : vector<1x128xf32>
    %57 = arith.subf %52, %50 : vector<1x128xf32>
    %58 = arith.subf %53, %51 : vector<1x128xf32>
    %59 = arith.mulf %57, %58 : vector<1x128xf32>
    %60 = arith.minimumf %48, %52 : vector<1x128xf32>
    %61 = arith.maximumf %46, %50 : vector<1x128xf32>
    %62 = arith.subf %60, %61 : vector<1x128xf32>
    %cst_20 = arith.constant 0.000000e+00 : f32
    %63 = vector.broadcast %cst_20 : f32 to vector<1x128xf32>
    %64 = arith.maximumf %62, %63 : vector<1x128xf32>
    %65 = arith.minimumf %49, %53 : vector<1x128xf32>
    %66 = arith.maximumf %47, %51 : vector<1x128xf32>
    %67 = arith.subf %65, %66 : vector<1x128xf32>
    %cst_21 = arith.constant 0.000000e+00 : f32
    %68 = vector.broadcast %cst_21 : f32 to vector<1x128xf32>
    %69 = arith.maximumf %67, %68 : vector<1x128xf32>
    %70 = arith.mulf %64, %69 : vector<1x128xf32>
    %71 = arith.addf %56, %59 : vector<1x128xf32>
    %72 = arith.subf %71, %70 : vector<1x128xf32>
    %cst_22 = arith.constant 1.000000e-07 : f32
    %73 = vector.broadcast %cst_22 : f32 to vector<1x128xf32>
    %74 = arith.maximumf %72, %73 : vector<1x128xf32>
    %75 = arith.divf %70, %74 : vector<1x128xf32>
    %76 = arith.maximumf %48, %52 : vector<1x128xf32>
    %77 = arith.minimumf %46, %50 : vector<1x128xf32>
    %78 = arith.subf %76, %77 : vector<1x128xf32>
    %79 = arith.maximumf %49, %53 : vector<1x128xf32>
    %80 = arith.minimumf %47, %51 : vector<1x128xf32>
    %81 = arith.subf %79, %80 : vector<1x128xf32>
    %82 = arith.mulf %78, %81 : vector<1x128xf32>
    %cst_23 = arith.constant 1.000000e-07 : f32
    %83 = vector.broadcast %cst_23 : f32 to vector<1x128xf32>
    %84 = arith.maximumf %82, %83 : vector<1x128xf32>
    %85 = arith.subf %84, %74 : vector<1x128xf32>
    %86 = arith.divf %85, %84 : vector<1x128xf32>
    %87 = arith.subf %75, %86 : vector<1x128xf32>
    %cst_24 = arith.constant 1.000000e+00 : f32
    %88 = vector.broadcast %cst_24 : f32 to vector<1x128xf32>
    %89 = arith.subf %88, %87 : vector<1x128xf32>
    %c0_25 = arith.constant 0 : index
    %c0_26 = arith.constant 0 : index
    %90 = vector.load %arg5[%c0_25, %c0_26] : memref<1x128xf32, #tpu.memory_space<vmem>>, vector<1x128xf32>
    %91 = arith.mulf %89, %90 : vector<1x128xf32>
    %c0_27 = arith.constant 0 : index
    %c0_28 = arith.constant 0 : index
    %92 = vector.load %arg13[%c0_27, %c0_28] : memref<1x128xf32, #tpu.memory_space<vmem>>, vector<1x128xf32>
    %93 = arith.addf %92, %91 : vector<1x128xf32>
    %c0_29 = arith.constant 0 : index
    %c0_30 = arith.constant 0 : index
    %94 = vector.load %arg13[%c0_29, %c0_30] : memref<1x128xf32, #tpu.memory_space<vmem>>, vector<1x128xf32>
    tpu.vector_store %arg13[%c0_29, %c0_30], %93 {strides = array<i32>} : memref<1x128xf32, #tpu.memory_space<vmem>>, vector<1x128xf32>,
    %c0_31 = arith.constant 0 : index
    %c0_32 = arith.constant 0 : index
    %95 = vector.load %arg6[%c0_31, %c0_32] : memref<1x128xf32, #tpu.memory_space<vmem>>, vector<1x128xf32>
    %c0_33 = arith.constant 0 : index
    %c0_34 = arith.constant 0 : index
    %96 = vector.load %arg7[%c0_33, %c0_34] : memref<1x128xf32, #tpu.memory_space<vmem>>, vector<1x128xf32>
    %cst_35 = arith.constant 0.000000e+00 : f32
    %97 = vector.broadcast %cst_35 : f32 to vector<1x128xf32>
    %98 = arith.maximumf %95, %97 : vector<1x128xf32>
    %99 = arith.mulf %95, %96 : vector<1x128xf32>
    %100 = arith.subf %98, %99 : vector<1x128xf32>
    %101 = math.absf %95 : vector<1x128xf32>
    %cst_36 = arith.constant 0.000000e+00 : f32
    %102 = vector.broadcast %cst_36 : f32 to vector<1x128xf32>
    %103 = arith.subf %102, %101 : vector<1x128xf32>
    %104 = math.exp %103 : vector<1x128xf32>
    %105 = math.log1p %104 : vector<1x128xf32>
    %106 = arith.addf %100, %105 : vector<1x128xf32>
    %c0_37 = arith.constant 0 : index
    %c0_38 = arith.constant 0 : index
    %107 = vector.load %arg8[%c0_37, %c0_38] : memref<1x128xf32, #tpu.memory_space<vmem>>, vector<1x128xf32>
    %108 = arith.mulf %106, %107 : vector<1x128xf32>
    %cst_39 = arith.constant dense<0.000000e+00> : vector<128xf32>
    %109 = vector.multi_reduction <add>, %108, %cst_39 [0] : vector<1x128xf32> to vector<128xf32>
    %110 = vector.shape_cast %109 : vector<128xf32> to vector<1x128xf32>
    %c0_40 = arith.constant 0 : index
    %c0_41 = arith.constant 0 : index
    %111 = vector.load %arg14[%c0_40, %c0_41] : memref<1x128xf32, #tpu.memory_space<vmem>>, vector<1x128xf32>
    %112 = arith.addf %111, %110 : vector<1x128xf32>
    %c0_42 = arith.constant 0 : index
    %c0_43 = arith.constant 0 : index
    %113 = vector.load %arg14[%c0_42, %c0_43] : memref<1x128xf32, #tpu.memory_space<vmem>>, vector<1x128xf32>
    tpu.vector_store %arg14[%c0_42, %c0_43], %112 {strides = array<i32>} : memref<1x128xf32, #tpu.memory_space<vmem>>, vector<1x128xf32>,
    %c0_i32_44 = arith.constant 0 : i32
    %114 = arith.cmpi eq, %arg1, %c0_i32_44 : i32
    %115 = arith.extui %114 : i1 to i32
    %c0_i32_45 = arith.constant 0 : i32
    %116 = arith.cmpi ne, %115, %c0_i32_45 : i32
    scf.if %116 {
      %c0_46 = arith.constant 0 : index
      %c0_47 = arith.constant 0 : index
      %117 = vector.load %arg12[%c0_46, %c0_47] : memref<1x128xf32, #tpu.memory_space<vmem>>, vector<1x128xf32>
      %118 = vector.shape_cast %117 : vector<1x128xf32> to vector<1x1x128xf32>
      %c0_48 = arith.constant 0 : index
      %c0_49 = arith.constant 0 : index
      %c0_50 = arith.constant 0 : index
      %119 = vector.load %arg9[%c0_48, %c0_49, %c0_50] : memref<1x1x128xf32, #tpu.memory_space<vmem>>, vector<1x1x128xf32>
      tpu.vector_store %arg9[%c0_48, %c0_49, %c0_50], %118 {strides = array<i32>} : memref<1x1x128xf32, #tpu.memory_space<vmem>>, vector<1x1x128xf32>,
      %c0_51 = arith.constant 0 : index
      %c0_52 = arith.constant 0 : index
      %120 = vector.load %arg13[%c0_51, %c0_52] : memref<1x128xf32, #tpu.memory_space<vmem>>, vector<1x128xf32>
      %121 = vector.shape_cast %120 : vector<1x128xf32> to vector<1x1x128xf32>
      %c0_53 = arith.constant 0 : index
      %c0_54 = arith.constant 0 : index
      %c0_55 = arith.constant 0 : index
      %122 = vector.load %arg10[%c0_53, %c0_54, %c0_55] : memref<1x1x128xf32, #tpu.memory_space<vmem>>, vector<1x1x128xf32>
      tpu.vector_store %arg10[%c0_53, %c0_54, %c0_55], %121 {strides = array<i32>} : memref<1x1x128xf32, #tpu.memory_space<vmem>>, vector<1x1x128xf32>,
      %c0_56 = arith.constant 0 : index
      %c0_57 = arith.constant 0 : index
      %123 = vector.load %arg14[%c0_56, %c0_57] : memref<1x128xf32, #tpu.memory_space<vmem>>, vector<1x128xf32>
      %124 = vector.shape_cast %123 : vector<1x128xf32> to vector<1x1x128xf32>
      %c0_58 = arith.constant 0 : index
      %c0_59 = arith.constant 0 : index
      %c0_60 = arith.constant 0 : index
      %125 = vector.load %arg11[%c0_58, %c0_59, %c0_60] : memref<1x1x128xf32, #tpu.memory_space<vmem>>, vector<1x1x128xf32>
      tpu.vector_store %arg11[%c0_58, %c0_59, %c0_60], %124 {strides = array<i32>} : memref<1x1x128xf32, #tpu.memory_space<vmem>>, vector<1x1x128xf32>,
    } else {
    }
    return
  }
  func.func @transform_0(%arg0: i32, %arg1: i32) -> (i32, i32) {
    %c1_i32 = arith.constant 1 : i32
    %0 = arith.muli %arg0, %c1_i32 : i32
    %1 = arith.addi %0, %arg1 : i32
    %c0_i32 = arith.constant 0 : i32
    %2 = arith.minsi %1, %c0_i32 : i32
    %c0_i32_0 = arith.constant 0 : i32
    %c0_i32_1 = arith.constant 0 : i32
    return %2, %c0_i32_0 : i32, i32
  }
  func.func @transform_1(%arg0: i32, %arg1: i32) -> (i32, i32) {
    %c1_i32 = arith.constant 1 : i32
    %0 = arith.muli %arg0, %c1_i32 : i32
    %1 = arith.addi %0, %arg1 : i32
    %c0_i32 = arith.constant 0 : i32
    %2 = arith.minsi %1, %c0_i32 : i32
    %c0_i32_0 = arith.constant 0 : i32
    %c0_i32_1 = arith.constant 0 : i32
    return %2, %c0_i32_0 : i32, i32
  }
  func.func @transform_2(%arg0: i32, %arg1: i32) -> (i32, i32) {
    %c1_i32 = arith.constant 1 : i32
    %0 = arith.muli %arg0, %c1_i32 : i32
    %1 = arith.addi %0, %arg1 : i32
    %c0_i32 = arith.constant 0 : i32
    %2 = arith.minsi %1, %c0_i32 : i32
    %c0_i32_0 = arith.constant 0 : i32
    %c0_i32_1 = arith.constant 0 : i32
    return %c0_i32_0, %2 : i32, i32
  }
  func.func @transform_3(%arg0: i32, %arg1: i32) -> (i32, i32) {
    %c1_i32 = arith.constant 1 : i32
    %0 = arith.muli %arg0, %c1_i32 : i32
    %1 = arith.addi %0, %arg1 : i32
    %c0_i32 = arith.constant 0 : i32
    %2 = arith.minsi %1, %c0_i32 : i32
    %c0_i32_0 = arith.constant 0 : i32
    %c0_i32_1 = arith.constant 0 : i32
    return %c0_i32_0, %2 : i32, i32
  }
  func.func @transform_4(%arg0: i32, %arg1: i32) -> (i32, i32) {
    %c1_i32 = arith.constant 1 : i32
    %0 = arith.muli %arg0, %c1_i32 : i32
    %1 = arith.addi %0, %arg1 : i32
    %c0_i32 = arith.constant 0 : i32
    %2 = arith.minsi %1, %c0_i32 : i32
    %c0_i32_0 = arith.constant 0 : i32
    %c0_i32_1 = arith.constant 0 : i32
    return %2, %c0_i32_0 : i32, i32
  }
  func.func @transform_5(%arg0: i32, %arg1: i32) -> (i32, i32) {
    %c1_i32 = arith.constant 1 : i32
    %0 = arith.muli %arg0, %c1_i32 : i32
    %1 = arith.addi %0, %arg1 : i32
    %c0_i32 = arith.constant 0 : i32
    %2 = arith.minsi %1, %c0_i32 : i32
    %c0_i32_0 = arith.constant 0 : i32
    %c0_i32_1 = arith.constant 0 : i32
    return %2, %c0_i32_0 : i32, i32
  }
  func.func @transform_6(%arg0: i32, %arg1: i32) -> (i32, i32) {
    %c1_i32 = arith.constant 1 : i32
    %0 = arith.muli %arg0, %c1_i32 : i32
    %1 = arith.addi %0, %arg1 : i32
    %c0_i32 = arith.constant 0 : i32
    %2 = arith.minsi %1, %c0_i32 : i32
    %c0_i32_0 = arith.constant 0 : i32
    %c0_i32_1 = arith.constant 0 : i32
    return %2, %c0_i32_0 : i32, i32
  }
  func.func @transform_7(%arg0: i32, %arg1: i32) -> (i32, i32, i32) {
    %c0_i32 = arith.constant 0 : i32
    %c0_i32_0 = arith.constant 0 : i32
    %c0_i32_1 = arith.constant 0 : i32
    return %arg0, %c0_i32, %c0_i32_0 : i32, i32, i32
  }
  func.func @transform_8(%arg0: i32, %arg1: i32) -> (i32, i32, i32) {
    %c0_i32 = arith.constant 0 : i32
    %c0_i32_0 = arith.constant 0 : i32
    %c0_i32_1 = arith.constant 0 : i32
    return %arg0, %c0_i32, %c0_i32_0 : i32, i32, i32
  }
  func.func @transform_9(%arg0: i32, %arg1: i32) -> (i32, i32, i32) {
    %c0_i32 = arith.constant 0 : i32
    %c0_i32_0 = arith.constant 0 : i32
    %c0_i32_1 = arith.constant 0 : i32
    return %arg0, %c0_i32, %c0_i32_0 : i32, i32, i32
  }
}

</mosaic_0001>

<bundles_post_ra>
// kernel: tpu_custom_call.1
= control target key start
LH: loop header
LB: loop body
LE: loop exit
PB: predicated region body
PF: predicated region fallthrough
CT: control target
= control target key end

     0   :  { %15 = vsyncpa [#allocation6], 0  ;;  %s809_s0 = inlined_call_operand.hbm [shape: f32[8,128], index: 0, kind: input, shape index: {}]   ;;  %s810_s1 = inlined_call_operand.hbm [shape: f32[8,128], index: 1, kind: input, shape index: {}]   ;;  %s811_s2 = inlined_call_operand.hbm [shape: f32[8,128], index: 2, kind: input, shape index: {}]   ;;  %s812_s3 = inlined_call_operand.vmem [shape: f32[1,128], index: 3, kind: input, shape index: {}]   ;;  %s813_s4 = inlined_call_operand.vmem [shape: f32[1,128], index: 4, kind: input, shape index: {}]   ;;  %s814_s5 = inlined_call_operand.vmem [shape: f32[1,128], index: 5, kind: input, shape index: {}]   ;;  %s815_s6 = inlined_call_operand.vmem [shape: f32[1,128], index: 6, kind: input, shape index: {}]   ;;  %s816_s7 = inlined_call_operand.hbm [shape: f32[1,1,128], index: 7, kind: output, shape index: {0}]   ;;  %s817_s8 = inlined_call_operand.hbm [shape: f32[1,1,128], index: 8, kind: output, shape index: {1}]   ;;  %s818_s9 = inlined_call_operand.hbm [shape: f32[1,1,128], index: 9, kind: output, shape index: {2}]  }
   0x1   :  { %16 = vsyncpa [#allocation9], 0 }
   0x2   :  { %17 = vsyncpa [#allocation7], 0  ;;  %s45_s11 = sshll.u32 %s810_s1, 4  ;;  %s46_s11 = int_to_ptr.hbm [resolvable:$true] %s45_s11 }
   0x3   :  { %18 = vsyncpa [#allocation13], 0  ;;  %s615_s12 = smov [#allocation8]   ;;  %s29_s16 = sshll.u32 %s809_s0, 4  ;;  %s30_s16 = int_to_ptr.hbm [resolvable:$true] %s29_s16 }
   0x4   :  { %s47_s13 = sshll.u32 %s615_s12, 4  ;;  %s616_s17 = smov [#allocation5]   ;;  %s48_s13 = int_to_ptr.vmem [resolvable:$true] %s47_s13 }
   0x5   :  { %50 = dma.hbm_to_vmem [thread:$0]  %s46_s11, 128, %s48_s13, [#allocation9]  }
   0x6   :  { %s31_s18 = sshll.u32 %s616_s17, 4  ;;  %s61_s21 = sshll.u32 %s811_s2, 4  ;;  %s32_s18 = int_to_ptr.vmem [resolvable:$true] %s31_s18  ;;  %s62_s21 = int_to_ptr.hbm [resolvable:$true] %s61_s21 }
   0x7   :  { %34 = dma.hbm_to_vmem [thread:$0]  %s30_s16, 128, %s32_s18, [#allocation6]  }
   0x8   :  { %s617_s1 = smov [#allocation10]  }
   0x9   :  { %s63_s22 = sshll.u32 %s617_s1, 4  ;;  %s64_s22 = int_to_ptr.vmem [resolvable:$true] %s63_s22 }
   0xa   :  { %66 = dma.hbm_to_vmem [thread:$0]  %s62_s21, 128, %s64_s22, [#allocation9]  }
   0xb   :  { %607 = dma.done.wait [#allocation6], 128  }
   0xc   :  { %608 = vsyncadd [#allocation6], 4294967168 }
   0xd   :  { %609 = dma.done.wait [#allocation9], 256  }
   0xe   :  { %610 = vsyncadd [#allocation9], 4294967040  ;;  %v618_v0 = vmov 0.0   ;;  %v257_v1 = vld [vmem:[#allocation10] sm:$0xff]  ;;  %v681_v2 = vld [vmem:[#allocation5] sm:$0xff]  ;;  %s392_s29 = sshll.u32 %s817_s8, 4  ;;  %s393_s29 = int_to_ptr.hbm [resolvable:$true] %s392_s29 }
   0xf   :  { %197 = vst [vmem:[#allocation3] sm:$0x1] %v618_v0  ;;  %v259_v3 = vrot.slane %v257_v1, 6  ;;  %v266_v4 = vrot.slane %v257_v1, 4  ;;  %v201_v5 = vand.u32 2147483647, %v681_v2 }
  0x10   :  { %196 = vst [vmem:[#allocation2] sm:$0x1] %v618_v0  ;;  %v687_v6 = vld [vmem:[%s813_s4] sm:$0x1]  ;;  %v696_v30 = vld [vmem:[#allocation8] sm:$0xff]  ;;  %v233_v39 = vmax.f32 %v681_v2, 0.0 }
  0x11   :  { %198 = vst [vmem:[#allocation4] sm:$0x1] %v618_v0  ;;  %v345_v7 = vand.u32 2147483647, %v687_v6  ;;  %v261_v8 = vsub.f32 %v257_v1, %v259_v3  ;;  %v268_v9 = vmin.f32 %v257_v1, %v266_v4  ;;  %v269_v10 = vmax.f32 %v257_v1, %v266_v4  ;;  %v341_v53 = vld [vmem:[%s814_s5] sm:$0x1] }
  0x12   :  { %v202_v11 = vsub.f32 0.0, %v201_v5  ;;  %v226_v33 = vsub.f32 1.0, %v696_v30  ;;  %v234_v40 = vmul.f32 %v696_v30, %v681_v2  ;;  %v714_v43 = vmul.f32 0.25, %v696_v30  ;;  %s620_s30 = smov [#allocation14]   ;;  %s403_s13 = sshll.u32 %s818_s9, 4  ;;  %s404_s13 = int_to_ptr.hbm [resolvable:$true] %s403_s13 }
  0x13   :  { %v346_v12 = vsub.f32 0.0, %v345_v7  ;;  %v263_v13 = vrot.slane %v261_v8, 1  ;;  %v271_v14 = vrot.slane %v269_v10, 6  ;;  %v301_v15 = vrot.slane %v268_v9, 6  ;;  %s401_s10 = sshll.u32 %s620_s30, 4  ;;  %s621_s14 = smov [#allocation11]   ;;  %s402_s10 = int_to_ptr.vmem [resolvable:$true] %s401_s10 }
  0x14   :  { %v203_v16 = vmul.f32 1.442695, %v202_v11  ;;  %v718_v44 = vmul.f32 0.75, %v226_v33  ;;  %vm221_vm6 = vcmp.ge.f32.partialorder %v681_v2, 0.0  ;;  %v342_v59 = vmax.f32 %v687_v6, 0.0  ;;  %s379_s15 = sshll.u32 %s621_s14, 4  ;;  %s380_s15 = int_to_ptr.vmem [resolvable:$true] %s379_s15 }
  0x15   :  { %v265_v17 = vmul.f32 %v263_v13, %v261_v8  ;;  %v273_v18 = vsub.f32 %v268_v9, %v271_v14  ;;  %v303_v19 = vsub.f32 %v269_v10, %v301_v15  ;;  %v347_v20 = vmul.f32 1.442695, %v346_v12  ;;  %s381_s8 = sshll.u32 %s816_s7, 4  ;;  %s382_s8 = int_to_ptr.hbm [resolvable:$true] %s381_s8 }
  0x16   :  { %449 = vpow2.f32 %v203_v16  ;;  %v343_v63 = vmul.f32 %v341_v53, %v687_v6 }
  0x17   :  { %v274_v21 = vmax.f32 %v273_v18, 0.0  ;;  %v280_v22 = vrot.slane %v265_v17, 4  ;;  %v305_v23 = vrot.slane %v303_v19, 1  ;;  %451 = vpow2.f32 %v347_v20 }
  0x18   :  { %v344_v18 = vsub.f32 %v342_v59, %v343_v63 }
  0x19   :  { %v276_v24 = vrot.slane %v274_v21, 1  ;;  %v282_v25 = vadd.f32 %v280_v22, %v265_v17  ;;  %v307_v26 = vmul.f32 %v305_v23, %v303_v19 }
  0x1b   :  { %v692_v28 = vmul.f32 %v276_v24, %v274_v21  ;;  %v694_v29 = vmax.f32 %v307_v26, 1e-07 }
  0x1c   :  { %v690_v27 = vpop.eup %449 }
  0x1d   :  { %v205_v31 = vadd.f32 1.0, %v690_v27  ;;  %v283_v32 = vsub.f32 %v282_v25, %v692_v28  ;;  %453 = vrcp.f32 %v694_v29  ;;  %v319_v35 = vand.u32 2147483647, %v694_v29  ;;  %v452_v36 = vpop.eup %451 }
  0x1e   :  { %v321_v37 = vand.u32 2147483648, %v694_v29  ;;  %v239_v41 = vmul.f32 -0.5, %v690_v27  ;;  %v242_v42 = vand.u32 2147483647, %v690_v27  ;;  %vm315_vm0 = vweird.f32 %v694_v29 }
  0x1f   :  { %455 = vrcp.f32 %v205_v31  ;;  %v702_v34 = vmax.f32 %v283_v32, 1e-07  ;;  %v215_v38 = vand.u32 2147483647, %v205_v31  ;;  %vm720_vm1 = vcmp.eq.f32.partialorder %v319_v35, 8.507059e+37 }
  0x20   :  { %vm211_vm2 = vweird.f32 %v205_v31  ;;  %v217_v47 = vand.u32 2147483648, %v205_v31  ;;  %v349_v48 = vadd.f32 1.0, %v452_v36  ;;  %v322_v51 = vor.u32 1.1754944e-38, %v321_v37 }
  0x21   :  { %457 = vrcp.f32 %v702_v34  ;;  %vm725_vm3 = vcmp.eq.f32.partialorder %v215_v38, 8.507059e+37  ;;  %v352_v54 = vmul.f32 -0.5, %v452_v36  ;;  %v240_v56 = vadd.f32 1.0, %v239_v41 }
  0x22   :  { %459 = vlog2.f32 %v205_v31  ;;  %vm732_vm4 = vcmp.lt.f32.partialorder %v242_v42, 0.0004427343  ;;  %v355_v0 = vand.u32 2147483647, %v452_v36  ;;  %vm290_vm8 = vweird.f32 %v702_v34  ;;  %v362_v42 = vld [vmem:[#allocation4] sm:$0x1] }
  0x23   :  { %v454_v45 = vpop.eup %453  ;;  %461 = vlog2.f32 %v349_v48  ;;  %v353_v60 = vadd.f32 1.0, %v352_v54  ;;  %v294_v4 = vand.u32 2147483647, %v702_v34  ;;  %v296_v7 = vand.u32 2147483648, %v702_v34  ;;  %v448_v54 = vld [vmem:[%s812_s3] ss:$0 sm:$0xff] }
  0x24   :  { %v311_v50 = vmul.f32 %v454_v45, %v694_v29  ;;  %vm316_vm5 = vweird.f32 %v454_v45  ;;  %v218_v6 = vor.u32 1.1754944e-38, %v217_v47  ;;  %v241_v10 = vmul.f32 %v690_v27, %v240_v56  ;;  %s619_s3 = smov [#allocation12]  }
  0x25   :  { %v456_v49 = vpop.eup %455  ;;  %vm746_vm9 = vmor %vm315_vm0, %vm316_vm5  ;;  %v354_v14 = vmul.f32 %v452_v36, %v353_v60  ;;  %vm757_vm12 = vcmp.lt.f32.partialorder %v355_v0, 0.0004427343  ;;  %v309_v21 = vsub.f32 %v694_v29, %v702_v34  ;;  %v297_v25 = vor.u32 1.1754944e-38, %v296_v7  ;;  %v359_v36 = vld [vmem:[%s815_s6] sm:$0x1]  ;;  %s390_s26 = sshll.u32 %s619_s3, 4  ;;  %s391_s26 = int_to_ptr.vmem [resolvable:$true] %s390_s26 }
  0x26   :  { %v207_v55 = vmul.f32 %v456_v49, %v205_v31  ;;  %v312_v58 = vsub.f32 1.0, %v311_v50  ;;  %vm212_vm7 = vweird.f32 %v456_v49  ;;  %v235_v29 = vsub.f32 %v233_v39, %v234_v40  ;;  %v332_v60 = vld [vmem:[#allocation3] sm:$0x1] }
  0x27   :  { %v458_v61 = vpop.eup %457  ;;  %vm753_vm11 = vmor %vm211_vm2, %vm212_vm7  ;;  %vm295_vm14 = vcmp.eq.f32.partialorder %v294_v4, 8.507059e+37  ;;  %v232_v47 = vadd.f32 %v718_v44, %v714_v43 }
  0x28   :  { %v208_v62 = vsub.f32 1.0, %v207_v55  ;;  %v460_v1 = vpop.eup %459  ;;  %v286_v3 = vmul.f32 %v458_v61, %v702_v34  ;;  %v313_v5 = vmul.f32 %v454_v45, %v312_v58  ;;  %vm291_vm10 = vweird.f32 %v458_v61 }
  0x29   :  { %v462_v15 = vpop.eup %461  ;;  %v238_v17 = vmul.f32 0.6931472, %v460_v1  ;;  %vm767_vm13 = vmor %vm290_vm8, %vm291_vm10 }
  0x2a   :  { %v209_v9 = vmul.f32 %v456_v49, %v208_v62  ;;  %v287_v11 = vsub.f32 1.0, %v286_v3  ;;  %v314_v12 = vadd.f32 %v454_v45, %v313_v5  ;;  %v351_v23 = vmul.f32 0.6931472, %v462_v15 }
  0x2b   :  { %v244_v38 = vsel %vm732_vm4, %v241_v10, %v238_v17 }
  0x2c   :  { %v210_v16 = vadd.f32 %v456_v49, %v209_v9  ;;  %v288_v20 = vmul.f32 %v458_v61, %v287_v11  ;;  %v318_v22 = vsel %vm746_vm9, %v454_v45, %v314_v12  ;;  %v357_v34 = vsel %vm757_vm12, %v354_v14, %v351_v23 }
  0x2d   :  { %v323_v26 = vsel %vm720_vm1, %v322_v51, %v318_v22  ;;  %v358_v41 = vadd.f32 %v357_v34, %v344_v18  ;;  %v245_v51 = vadd.f32 %v244_v38, %v235_v29 }
  0x2e   :  { %v214_v31 = vsel %vm753_vm11, %v456_v49, %v210_v16  ;;  %v289_v32 = vadd.f32 %v458_v61, %v288_v20  ;;  %v324_v40 = vmul.f32 %v323_v26, %v309_v21 }
  0x2f   :  { %v219_v35 = vsel %vm725_vm3, %v218_v6, %v214_v31  ;;  %v360_v48 = vmul.f32 %v359_v36, %v358_v41  ;;  %v246_v43 = vmul.f32 %v245_v51, %v232_v47 }
  0x30   :  { %v222_v37 = vmul.f32 %v690_v27, %v219_v35  ;;  %v293_v39 = vsel %vm767_vm13, %v458_v61, %v289_v32 }
  0x31   :  { %v298_v45 = vsel %vm295_vm14, %v297_v25, %v293_v39  ;;  %v363_v52 = vadd.f32 %v362_v42, %v360_v48 }
  0x32   :  { %v223_v46 = vsel %vm221_vm6, %v219_v35, %v222_v37  ;;  %v299_v49 = vmul.f32 %v298_v45, %v692_v28 }
  0x33   :  { %v224_v27 = vsub.f32 1.0, %v223_v46  ;;  %v227_v50 = vmul.f32 %v226_v33, %v223_v46  ;;  %364 = vst [vmem:[#allocation4] sm:$0x1] %v363_v52 }
  0x34   :  { %v325_v53 = vsub.f32 %v299_v49, %v324_v40 }
  0x35   :  { %v225_v2 = vmul.f32 %v224_v27, %v696_v30  ;;  %v254_v30 = vld [vmem:[#allocation2] sm:$0x1] }
  0x36   :  { %v326_v55 = vsub.f32 1.0, %v325_v53 }
  0x37   :  { %v228_v56 = vadd.f32 %v227_v50, %v225_v2 }
  0x38   :  { %v331_v44 = vmul.f32 %v448_v54, %v326_v55 }
  0x39   :  { %v229_v57 = vmul.f32 %v228_v56, %v228_v56 }
  0x3a   :  { %334 = vst [vmem:[#allocation1] sm:$0xff] %v331_v44  ;;  %v372_v59 = vld [vmem:[#allocation4] sm:$0x1] }
  0x3b   :  { %v247_v28 = vmul.f32 %v246_v43, %v229_v57  ;;  %373 = vst [vmem:[#allocation14] sm:$0x1] %v372_v59 }
  0x3d   :  { %v248_v58 = vrot.slane %v247_v28, 4 }
  0x3f   :  { %v249_v33 = vadd.f32 %v248_v58, %v247_v28 }
  0x41   :  { %v250_v61 = vrot.slane %v249_v33, 2  ;;  %v336_v62 = vld [vmem:[#allocation1 + $0x2] ss:$9 sm:$0xff] }
  0x42   :  { %v338_v63 = vadd.f32 %v336_v62, %v332_v60 }
  0x43   :  { %v251_v0 = vadd.f32 %v250_v61, %v249_v33 }
  0x44   :  { %339 = vst [vmem:[#allocation3] sm:$0x1] %v338_v63 }
  0x45   :  { %v252_v1 = vrot.slane %v251_v0, 1 }
  0x47   :  { %v253_v3 = vadd.f32 %v252_v1, %v251_v0 }
  0x49   :  { %v255_v4 = vadd.f32 %v254_v30, %v253_v3 }
  0x4b   :  { %256 = vst [vmem:[#allocation2] sm:$0x1] %v255_v4  ;;  %v370_v5 = vld [vmem:[#allocation3] sm:$0x1] }
  0x4c   :  { %371 = vst [vmem:[#allocation12] sm:$0x1] %v370_v5 }
  0x4d   :  { %395 = dma.vmem_to_hbm [thread:$0]  %s391_s26, 16, %s393_s29, [#allocation13]  }
  0x4e   :  { %406 = dma.vmem_to_hbm [thread:$0]  %s402_s10, 16, %s404_s13, [#allocation13]  }
  0x52   :  { %v368_v7 = vld [vmem:[#allocation2] sm:$0x1] }
  0x53   :  { %369 = vst [vmem:[#allocation11] sm:$0x1] %v368_v7 }
  0x54   :  { %384 = dma.vmem_to_hbm [thread:$0]  %s380_s15, 16, %s382_s8, [#allocation7]  }
  0x55   :  { %611 = dma.done.wait [#allocation7], 16  }
  0x56   :  { %612 = vsyncadd [#allocation7], 4294967280 }
  0x57   :  { %613 = dma.done.wait [#allocation13], 32  }
  0x58   :  { %614 = vsyncadd [#allocation13], 4294967264 }
  0x59   :  { %419 = vsyncpa [#allocation6], 1 }
  0x5a   :  { %420 = vsyncpa [#allocation9], 1 }
  0x5b   :  { %421 = vsyncpa [#allocation7], 1 }
  0x5c   :  { %422 = vsyncpa [#allocation13], 1 }

</bundles_post_ra>
